<compile_context>
chip_gen: v7x
topology: tpu7x:2x2x1
jax: 0.10.0
libtpu: 0.0.40
codegen_flags: <defaults>
</compile_context>

<pallas_src>
import math
import functools

import jax
import jax.numpy as jnp
from jax import lax
from jax.experimental import pallas as pl
from jax.experimental.pallas import tpu as pltpu


# ---------------------------------------------------------------------------
# Fused Pallas kernel: projections + multi-head full attention + out proj
# ---------------------------------------------------------------------------

def _fused_attention_layer_kernel(
    q_in_ref, k_in_ref, v_in_ref,
    wq_ref, bq_ref, wk_ref, bk_ref, wv_ref, bv_ref, wo_ref, bo_ref,
    o_ref, *, n_heads,
):
    # One batch per grid step.
    xq = q_in_ref[0]            # (L, d_model)
    xk = k_in_ref[0]            # (S, d_model)
    xv = v_in_ref[0]            # (S, d_model)

    # y = x @ W.T + b  with torch-layout W (out, in): contract dim 1 with dim 1.
    def linear(x, w_ref, b_ref):
        return lax.dot_general(
            x, w_ref[...], (((1,), (1,)), ((), ())),
            preferred_element_type=jnp.float32,
        ) + b_ref[...]

    q = linear(xq, wq_ref, bq_ref)   # (L, d_model)
    k = linear(xk, wk_ref, bk_ref)   # (S, d_model)
    v = linear(xv, wv_ref, bv_ref)   # (S, d_model)

    d_model = q.shape[-1]
    E = d_model // n_heads
    scale = 1.0 / math.sqrt(E)

    # Per-head scaled-dot-product softmax attention (static head loop).
    head_outs = []
    for h in range(n_heads):
        lo, hi = h * E, (h + 1) * E
        qh = q[:, lo:hi] * scale    # (L, E) -- fold scale into the smaller tile
        kh = k[:, lo:hi]            # (S, E)
        vh = v[:, lo:hi]            # (S, E)

        # scores: contract on E without materializing kh.T
        s = lax.dot_general(
            qh, kh, (((1,), (1,)), ((), ())),
            preferred_element_type=jnp.float32,
        )                           # (L, S)

        s = s - jnp.max(s, axis=-1, keepdims=True)
        p = jnp.exp(s)
        p = p * pl.reciprocal(jnp.sum(p, axis=-1, keepdims=True), approx=True)

        head_outs.append(
            jnp.dot(p, vh, preferred_element_type=jnp.float32)   # (L, E)
        )

    attn = jnp.concatenate(head_outs, axis=-1)                   # (L, d_model)

    # Output projection; single lane-dense (L, d_model) store.
    out = lax.dot_general(
        attn, wo_ref[...], (((1,), (1,)), ((), ())),
        preferred_element_type=jnp.float32,
    ) + bo_ref[...]
    o_ref[0] = out.astype(o_ref.dtype)


def attention_layer_forward(params, queries, keys, values, n_heads):
    """Fused AttentionLayer forward: (B, L, d_model) -> (B, L, d_model)."""
    B, L, d_model = queries.shape
    _, S, _ = keys.shape

    kern = functools.partial(_fused_attention_layer_kernel, n_heads=n_heads)

    full_w = pl.BlockSpec((d_model, d_model), lambda b: (0, 0))
    full_b = pl.BlockSpec((1, d_model), lambda b: (0, 0))

    return pl.pallas_call(
        kern,
        out_shape=jax.ShapeDtypeStruct((B, L, d_model), queries.dtype),
        grid_spec=pltpu.PrefetchScalarGridSpec(
            num_scalar_prefetch=0,
            grid=(B,),
            in_specs=[
                pl.BlockSpec((1, L, d_model), lambda b: (b, 0, 0)),   # queries
                pl.BlockSpec((1, S, d_model), lambda b: (b, 0, 0)),   # keys
                pl.BlockSpec((1, S, d_model), lambda b: (b, 0, 0)),   # values
                full_w, full_b,                                       # wq, bq
                full_w, full_b,                                       # wk, bk
                full_w, full_b,                                       # wv, bv
                full_w, full_b,                                       # wo, bo
            ],
            out_specs=pl.BlockSpec((1, L, d_model), lambda b: (b, 0, 0)),
        ),
        compiler_params=pltpu.CompilerParams(
            dimension_semantics=("parallel",),
        ),
    )(
        queries, keys, values,
        params["wq"], params["bq"].reshape(1, d_model),
        params["wk"], params["bk"].reshape(1, d_model),
        params["wv"], params["bv"].reshape(1, d_model),
        params["wo"], params["bo"].reshape(1, d_model),
    )


# ---------------------------------------------------------------------------
# Pure-JAX reference (for correctness check)
# ---------------------------------------------------------------------------

def reference_forward(params, queries, keys, values, n_heads):
    B, L, d_model = queries.shape
    _, S, _ = keys.shape
    H = n_heads
    E = d_model // H
    q = (queries @ params["wq"].T + params["bq"]).reshape(B, L, H, E)
    k = (keys @ params["wk"].T + params["bk"]).reshape(B, S, H, E)
    v = (values @ params["wv"].T + params["bv"]).reshape(B, S, H, E)
    scale = 1.0 / math.sqrt(E)
    scores = jnp.einsum("blhe,bshe->bhls", q, k)
    A = jax.nn.softmax(scale * scores, axis=-1)
    V = jnp.einsum("bhls,bshd->blhd", A, v)
    out = V.reshape(B, L, d_model)
    return out @ params["wo"].T + params["bo"]


# ---------------------------------------------------------------------------
# main
# ---------------------------------------------------------------------------

if __name__ == "__main__":
    B, L, S, d_model, n_heads = 2, 8, 8, 32, 4

    key = jax.random.PRNGKey(0)
    ks = jax.random.split(key, 11)

    def init_linear(kw, kb, d):
        # deterministic, roughly torch-default scale
        bound = 1.0 / math.sqrt(d)
        w = jax.random.uniform(kw, (d, d), jnp.float32, -bound, bound)
        b = jax.random.uniform(kb, (d,), jnp.float32, -bound, bound)
        return w, b

    wq, bq = init_linear(ks[0], ks[1], d_model)
    wk, bk = init_linear(ks[2], ks[3], d_model)
    wv, bv = init_linear(ks[4], ks[5], d_model)
    wo, bo = init_linear(ks[6], ks[7], d_model)
    params = dict(wq=wq, bq=bq, wk=wk, bk=bk, wv=wv, bv=bv, wo=wo, bo=bo)

    queries = jax.random.normal(ks[8], (B, L, d_model), jnp.float32)
    keys_in = jax.random.normal(ks[9], (B, S, d_model), jnp.float32)
    values_in = jax.random.normal(ks[10], (B, S, d_model), jnp.float32)

    out = attention_layer_forward(params, queries, keys_in, values_in, n_heads)
    out = jax.block_until_ready(out)

    ref = reference_forward(params, queries, keys_in, values_in, n_heads)
    assert out.shape == (B, L, d_model)
    # tolerance slightly loosened vs pure-f32 because the softmax denominator
    # uses the EUP approximate reciprocal.
    assert jnp.allclose(out, ref, atol=2e-3, rtol=2e-3), "mismatch vs reference"

    print("KERNEL_OK")
</pallas_src>

<mosaic_0001>
module attributes {stable_mosaic.version = 11 : i64} {
  func.func @_fused_attention_layer_kernel(%arg0: i32, %arg1: memref<1x8x32xf32, #tpu.memory_space<vmem>>, %arg2: memref<1x8x32xf32, #tpu.memory_space<vmem>>, %arg3: memref<1x8x32xf32, #tpu.memory_space<vmem>>, %arg4: memref<32x32xf32, #tpu.memory_space<vmem>>, %arg5: memref<1x32xf32, #tpu.memory_space<vmem>>, %arg6: memref<32x32xf32, #tpu.memory_space<vmem>>, %arg7: memref<1x32xf32, #tpu.memory_space<vmem>>, %arg8: memref<32x32xf32, #tpu.memory_space<vmem>>, %arg9: memref<1x32xf32, #tpu.memory_space<vmem>>, %arg10: memref<32x32xf32, #tpu.memory_space<vmem>>, %arg11: memref<1x32xf32, #tpu.memory_space<vmem>>, %arg12: memref<1x8x32xf32, #tpu.memory_space<vmem>>) attributes {dimension_semantics = [#tpu.dimension_semantics<parallel>], iteration_bounds = array<i64: 2>, scalar_prefetch = 0 : i64, scratch_operands = 0 : i64, tpu.core_type = #tpu.core_type<tc>, window_params = [{transform_indices = @transform_0, window_bounds = array<i64: 1, 8, 32>}, {transform_indices = @transform_1, window_bounds = array<i64: 1, 8, 32>}, {transform_indices = @transform_2, window_bounds = array<i64: 1, 8, 32>}, {pipeline_mode = #tpu.pipeline_mode<synchronous>, transform_indices = @transform_3, window_bounds = array<i64: 32, 32>}, {pipeline_mode = #tpu.pipeline_mode<synchronous>, transform_indices = @transform_4, window_bounds = array<i64: 1, 32>}, {pipeline_mode = #tpu.pipeline_mode<synchronous>, transform_indices = @transform_5, window_bounds = array<i64: 32, 32>}, {pipeline_mode = #tpu.pipeline_mode<synchronous>, transform_indices = @transform_6, window_bounds = array<i64: 1, 32>}, {pipeline_mode = #tpu.pipeline_mode<synchronous>, transform_indices = @transform_7, window_bounds = array<i64: 32, 32>}, {pipeline_mode = #tpu.pipeline_mode<synchronous>, transform_indices = @transform_8, window_bounds = array<i64: 1, 32>}, {pipeline_mode = #tpu.pipeline_mode<synchronous>, transform_indices = @transform_9, window_bounds = array<i64: 32, 32>}, {pipeline_mode = #tpu.pipeline_mode<synchronous>, transform_indices = @transform_10, window_bounds = array<i64: 1, 32>}, {transform_indices = @transform_11, window_bounds = array<i64: 1, 8, 32>}]} {
    %c0 = arith.constant 0 : index
    %c0_0 = arith.constant 0 : index
    %c0_1 = arith.constant 0 : index
    %0 = vector.load %arg1[%c0, %c0_0, %c0_1] : memref<1x8x32xf32, #tpu.memory_space<vmem>>, vector<1x8x32xf32>
    %1 = vector.shape_cast %0 : vector<1x8x32xf32> to vector<8x32xf32>
    %c0_2 = arith.constant 0 : index
    %c0_3 = arith.constant 0 : index
    %c0_4 = arith.constant 0 : index
    %2 = vector.load %arg2[%c0_2, %c0_3, %c0_4] : memref<1x8x32xf32, #tpu.memory_space<vmem>>, vector<1x8x32xf32>
    %3 = vector.shape_cast %2 : vector<1x8x32xf32> to vector<8x32xf32>
    %c0_5 = arith.constant 0 : index
    %c0_6 = arith.constant 0 : index
    %c0_7 = arith.constant 0 : index
    %4 = vector.load %arg3[%c0_5, %c0_6, %c0_7] : memref<1x8x32xf32, #tpu.memory_space<vmem>>, vector<1x8x32xf32>
    %5 = vector.shape_cast %4 : vector<1x8x32xf32> to vector<8x32xf32>
    %c0_8 = arith.constant 0 : index
    %c0_9 = arith.constant 0 : index
    %6 = vector.load %arg4[%c0_8, %c0_9] : memref<32x32xf32, #tpu.memory_space<vmem>>, vector<32x32xf32>
    %cst = arith.constant dense<0.000000e+00> : vector<8x32xf32>
    %7 = tpu.matmul %1, %6, %cst {dimension_numbers = #tpu.dot_dimension_numbers<[1], [1], [0], [0], [0, 0, 1, 0], [], []>} : vector<8x32xf32>, vector<32x32xf32>, vector<8x32xf32> -> vector<8x32xf32>
    %c0_10 = arith.constant 0 : index
    %c0_11 = arith.constant 0 : index
    %8 = vector.load %arg5[%c0_10, %c0_11] : memref<1x32xf32, #tpu.memory_space<vmem>>, vector<1x32xf32>
    %9 = vector.broadcast %8 : vector<1x32xf32> to vector<8x32xf32>
    %10 = arith.addf %7, %9 : vector<8x32xf32>
    %c0_12 = arith.constant 0 : index
    %c0_13 = arith.constant 0 : index
    %11 = vector.load %arg6[%c0_12, %c0_13] : memref<32x32xf32, #tpu.memory_space<vmem>>, vector<32x32xf32>
    %cst_14 = arith.constant dense<0.000000e+00> : vector<8x32xf32>
    %12 = tpu.matmul %3, %11, %cst_14 {dimension_numbers = #tpu.dot_dimension_numbers<[1], [1], [0], [0], [0, 0, 1, 0], [], []>} : vector<8x32xf32>, vector<32x32xf32>, vector<8x32xf32> -> vector<8x32xf32>
    %c0_15 = arith.constant 0 : index
    %c0_16 = arith.constant 0 : index
    %13 = vector.load %arg7[%c0_15, %c0_16] : memref<1x32xf32, #tpu.memory_space<vmem>>, vector<1x32xf32>
    %14 = vector.broadcast %13 : vector<1x32xf32> to vector<8x32xf32>
    %15 = arith.addf %12, %14 : vector<8x32xf32>
    %c0_17 = arith.constant 0 : index
    %c0_18 = arith.constant 0 : index
    %16 = vector.load %arg8[%c0_17, %c0_18] : memref<32x32xf32, #tpu.memory_space<vmem>>, vector<32x32xf32>
    %cst_19 = arith.constant dense<0.000000e+00> : vector<8x32xf32>
    %17 = tpu.matmul %5, %16, %cst_19 {dimension_numbers = #tpu.dot_dimension_numbers<[1], [1], [0], [0], [0, 0, 1, 0], [], []>} : vector<8x32xf32>, vector<32x32xf32>, vector<8x32xf32> -> vector<8x32xf32>
    %c0_20 = arith.constant 0 : index
    %c0_21 = arith.constant 0 : index
    %18 = vector.load %arg9[%c0_20, %c0_21] : memref<1x32xf32, #tpu.memory_space<vmem>>, vector<1x32xf32>
    %19 = vector.broadcast %18 : vector<1x32xf32> to vector<8x32xf32>
    %20 = arith.addf %17, %19 : vector<8x32xf32>
    %21 = vector.extract_strided_slice %10 {offsets = [0, 0], sizes = [8, 8], strides = [1, 1]} : vector<8x32xf32> to vector<8x8xf32>
    %cst_22 = arith.constant 0.353553385 : f32
    %22 = vector.broadcast %cst_22 : f32 to vector<8x8xf32>
    %23 = arith.mulf %21, %22 : vector<8x8xf32>
    %24 = vector.extract_strided_slice %15 {offsets = [0, 0], sizes = [8, 8], strides = [1, 1]} : vector<8x32xf32> to vector<8x8xf32>
    %25 = vector.extract_strided_slice %20 {offsets = [0, 0], sizes = [8, 8], strides = [1, 1]} : vector<8x32xf32> to vector<8x8xf32>
    %cst_23 = arith.constant dense<0.000000e+00> : vector<8x8xf32>
    %26 = tpu.matmul %23, %24, %cst_23 {dimension_numbers = #tpu.dot_dimension_numbers<[1], [1], [0], [0], [0, 0, 1, 0], [], []>} : vector<8x8xf32>, vector<8x8xf32>, vector<8x8xf32> -> vector<8x8xf32>
    %cst_24 = arith.constant dense<0xFF800000> : vector<8xf32>
    %27 = vector.multi_reduction <maximumf>, %26, %cst_24 [1] : vector<8x8xf32> to vector<8xf32>
    %28 = vector.shape_cast %27 : vector<8xf32> to vector<8x1xf32>
    %29 = vector.broadcast %28 : vector<8x1xf32> to vector<8x8xf32>
    %30 = arith.subf %26, %29 : vector<8x8xf32>
    %31 = math.exp %30 : vector<8x8xf32>
    %cst_25 = arith.constant dense<0.000000e+00> : vector<8xf32>
    %32 = vector.multi_reduction <add>, %31, %cst_25 [1] : vector<8x8xf32> to vector<8xf32>
    %33 = vector.shape_cast %32 : vector<8xf32> to vector<8x1xf32>
    %34 = tpu.reciprocal %33 {approx = true} : vector<8x1xf32> -> vector<8x1xf32>
    %35 = vector.broadcast %34 : vector<8x1xf32> to vector<8x8xf32>
    %36 = arith.mulf %31, %35 : vector<8x8xf32>
    %cst_26 = arith.constant dense<0.000000e+00> : vector<8x8xf32>
    %37 = tpu.matmul %36, %25, %cst_26 {dimension_numbers = #tpu.dot_dimension_numbers<[1], [0], [0], [1], [0, 0, 1, 1], [], []>} : vector<8x8xf32>, vector<8x8xf32>, vector<8x8xf32> -> vector<8x8xf32>
    %38 = vector.extract_strided_slice %10 {offsets = [0, 8], sizes = [8, 8], strides = [1, 1]} : vector<8x32xf32> to vector<8x8xf32>
    %cst_27 = arith.constant 0.353553385 : f32
    %39 = vector.broadcast %cst_27 : f32 to vector<8x8xf32>
    %40 = arith.mulf %38, %39 : vector<8x8xf32>
    %41 = vector.extract_strided_slice %15 {offsets = [0, 8], sizes = [8, 8], strides = [1, 1]} : vector<8x32xf32> to vector<8x8xf32>
    %42 = vector.extract_strided_slice %20 {offsets = [0, 8], sizes = [8, 8], strides = [1, 1]} : vector<8x32xf32> to vector<8x8xf32>
    %cst_28 = arith.constant dense<0.000000e+00> : vector<8x8xf32>
    %43 = tpu.matmul %40, %41, %cst_28 {dimension_numbers = #tpu.dot_dimension_numbers<[1], [1], [0], [0], [0, 0, 1, 0], [], []>} : vector<8x8xf32>, vector<8x8xf32>, vector<8x8xf32> -> vector<8x8xf32>
    %cst_29 = arith.constant dense<0xFF800000> : vector<8xf32>
    %44 = vector.multi_reduction <maximumf>, %43, %cst_29 [1] : vector<8x8xf32> to vector<8xf32>
    %45 = vector.shape_cast %44 : vector<8xf32> to vector<8x1xf32>
    %46 = vector.broadcast %45 : vector<8x1xf32> to vector<8x8xf32>
    %47 = arith.subf %43, %46 : vector<8x8xf32>
    %48 = math.exp %47 : vector<8x8xf32>
    %cst_30 = arith.constant dense<0.000000e+00> : vector<8xf32>
    %49 = vector.multi_reduction <add>, %48, %cst_30 [1] : vector<8x8xf32> to vector<8xf32>
    %50 = vector.shape_cast %49 : vector<8xf32> to vector<8x1xf32>
    %51 = tpu.reciprocal %50 {approx = true} : vector<8x1xf32> -> vector<8x1xf32>
    %52 = vector.broadcast %51 : vector<8x1xf32> to vector<8x8xf32>
    %53 = arith.mulf %48, %52 : vector<8x8xf32>
    %cst_31 = arith.constant dense<0.000000e+00> : vector<8x8xf32>
    %54 = tpu.matmul %53, %42, %cst_31 {dimension_numbers = #tpu.dot_dimension_numbers<[1], [0], [0], [1], [0, 0, 1, 1], [], []>} : vector<8x8xf32>, vector<8x8xf32>, vector<8x8xf32> -> vector<8x8xf32>
    %55 = vector.extract_strided_slice %10 {offsets = [0, 16], sizes = [8, 8], strides = [1, 1]} : vector<8x32xf32> to vector<8x8xf32>
    %cst_32 = arith.constant 0.353553385 : f32
    %56 = vector.broadcast %cst_32 : f32 to vector<8x8xf32>
    %57 = arith.mulf %55, %56 : vector<8x8xf32>
    %58 = vector.extract_strided_slice %15 {offsets = [0, 16], sizes = [8, 8], strides = [1, 1]} : vector<8x32xf32> to vector<8x8xf32>
    %59 = vector.extract_strided_slice %20 {offsets = [0, 16], sizes = [8, 8], strides = [1, 1]} : vector<8x32xf32> to vector<8x8xf32>
    %cst_33 = arith.constant dense<0.000000e+00> : vector<8x8xf32>
    %60 = tpu.matmul %57, %58, %cst_33 {dimension_numbers = #tpu.dot_dimension_numbers<[1], [1], [0], [0], [0, 0, 1, 0], [], []>} : vector<8x8xf32>, vector<8x8xf32>, vector<8x8xf32> -> vector<8x8xf32>
    %cst_34 = arith.constant dense<0xFF800000> : vector<8xf32>
    %61 = vector.multi_reduction <maximumf>, %60, %cst_34 [1] : vector<8x8xf32> to vector<8xf32>
    %62 = vector.shape_cast %61 : vector<8xf32> to vector<8x1xf32>
    %63 = vector.broadcast %62 : vector<8x1xf32> to vector<8x8xf32>
    %64 = arith.subf %60, %63 : vector<8x8xf32>
    %65 = math.exp %64 : vector<8x8xf32>
    %cst_35 = arith.constant dense<0.000000e+00> : vector<8xf32>
    %66 = vector.multi_reduction <add>, %65, %cst_35 [1] : vector<8x8xf32> to vector<8xf32>
    %67 = vector.shape_cast %66 : vector<8xf32> to vector<8x1xf32>
    %68 = tpu.reciprocal %67 {approx = true} : vector<8x1xf32> -> vector<8x1xf32>
    %69 = vector.broadcast %68 : vector<8x1xf32> to vector<8x8xf32>
    %70 = arith.mulf %65, %69 : vector<8x8xf32>
    %cst_36 = arith.constant dense<0.000000e+00> : vector<8x8xf32>
    %71 = tpu.matmul %70, %59, %cst_36 {dimension_numbers = #tpu.dot_dimension_numbers<[1], [0], [0], [1], [0, 0, 1, 1], [], []>} : vector<8x8xf32>, vector<8x8xf32>, vector<8x8xf32> -> vector<8x8xf32>
    %72 = vector.extract_strided_slice %10 {offsets = [0, 24], sizes = [8, 8], strides = [1, 1]} : vector<8x32xf32> to vector<8x8xf32>
    %cst_37 = arith.constant 0.353553385 : f32
    %73 = vector.broadcast %cst_37 : f32 to vector<8x8xf32>
    %74 = arith.mulf %72, %73 : vector<8x8xf32>
    %75 = vector.extract_strided_slice %15 {offsets = [0, 24], sizes = [8, 8], strides = [1, 1]} : vector<8x32xf32> to vector<8x8xf32>
    %76 = vector.extract_strided_slice %20 {offsets = [0, 24], sizes = [8, 8], strides = [1, 1]} : vector<8x32xf32> to vector<8x8xf32>
    %cst_38 = arith.constant dense<0.000000e+00> : vector<8x8xf32>
    %77 = tpu.matmul %74, %75, %cst_38 {dimension_numbers = #tpu.dot_dimension_numbers<[1], [1], [0], [0], [0, 0, 1, 0], [], []>} : vector<8x8xf32>, vector<8x8xf32>, vector<8x8xf32> -> vector<8x8xf32>
    %cst_39 = arith.constant dense<0xFF800000> : vector<8xf32>
    %78 = vector.multi_reduction <maximumf>, %77, %cst_39 [1] : vector<8x8xf32> to vector<8xf32>
    %79 = vector.shape_cast %78 : vector<8xf32> to vector<8x1xf32>
    %80 = vector.broadcast %79 : vector<8x1xf32> to vector<8x8xf32>
    %81 = arith.subf %77, %80 : vector<8x8xf32>
    %82 = math.exp %81 : vector<8x8xf32>
    %cst_40 = arith.constant dense<0.000000e+00> : vector<8xf32>
    %83 = vector.multi_reduction <add>, %82, %cst_40 [1] : vector<8x8xf32> to vector<8xf32>
    %84 = vector.shape_cast %83 : vector<8xf32> to vector<8x1xf32>
    %85 = tpu.reciprocal %84 {approx = true} : vector<8x1xf32> -> vector<8x1xf32>
    %86 = vector.broadcast %85 : vector<8x1xf32> to vector<8x8xf32>
    %87 = arith.mulf %82, %86 : vector<8x8xf32>
    %cst_41 = arith.constant dense<0.000000e+00> : vector<8x8xf32>
    %88 = tpu.matmul %87, %76, %cst_41 {dimension_numbers = #tpu.dot_dimension_numbers<[1], [0], [0], [1], [0, 0, 1, 1], [], []>} : vector<8x8xf32>, vector<8x8xf32>, vector<8x8xf32> -> vector<8x8xf32>
    %89 = tpu.concatenate %37, %54, %71, %88 in 1 : vector<8x8xf32>, vector<8x8xf32>, vector<8x8xf32>, vector<8x8xf32> -> vector<8x32xf32>
    %c0_42 = arith.constant 0 : index
    %c0_43 = arith.constant 0 : index
    %90 = vector.load %arg10[%c0_42, %c0_43] : memref<32x32xf32, #tpu.memory_space<vmem>>, vector<32x32xf32>
    %cst_44 = arith.constant dense<0.000000e+00> : vector<8x32xf32>
    %91 = tpu.matmul %89, %90, %cst_44 {dimension_numbers = #tpu.dot_dimension_numbers<[1], [1], [0], [0], [0, 0, 1, 0], [], []>} : vector<8x32xf32>, vector<32x32xf32>, vector<8x32xf32> -> vector<8x32xf32>
    %c0_45 = arith.constant 0 : index
    %c0_46 = arith.constant 0 : index
    %92 = vector.load %arg11[%c0_45, %c0_46] : memref<1x32xf32, #tpu.memory_space<vmem>>, vector<1x32xf32>
    %93 = vector.broadcast %92 : vector<1x32xf32> to vector<8x32xf32>
    %94 = arith.addf %91, %93 : vector<8x32xf32>
    %c0_47 = arith.constant 0 : index
    %c0_48 = arith.constant 0 : index
    %c0_49 = arith.constant 0 : index
    %95 = vector.load %arg12[%c0_47, %c0_48, %c0_49] : memref<1x8x32xf32, #tpu.memory_space<vmem>>, vector<1x8x32xf32>
    %96 = vector.shape_cast %95 : vector<1x8x32xf32> to vector<8x32xf32>
    %97 = vector.shape_cast %94 : vector<8x32xf32> to vector<1x8x32xf32>
    tpu.vector_store %arg12[%c0_47, %c0_48, %c0_49], %97 {strides = array<i32>} : memref<1x8x32xf32, #tpu.memory_space<vmem>>, vector<1x8x32xf32>,
    return
  }
  func.func @transform_0(%arg0: i32) -> (i32, i32, i32) {
    %c0_i32 = arith.constant 0 : i32
    %c0_i32_0 = arith.constant 0 : i32
    %c0_i32_1 = arith.constant 0 : i32
    return %arg0, %c0_i32, %c0_i32_0 : i32, i32, i32
  }
  func.func @transform_1(%arg0: i32) -> (i32, i32, i32) {
    %c0_i32 = arith.constant 0 : i32
    %c0_i32_0 = arith.constant 0 : i32
    %c0_i32_1 = arith.constant 0 : i32
    return %arg0, %c0_i32, %c0_i32_0 : i32, i32, i32
  }
  func.func @transform_2(%arg0: i32) -> (i32, i32, i32) {
    %c0_i32 = arith.constant 0 : i32
    %c0_i32_0 = arith.constant 0 : i32
    %c0_i32_1 = arith.constant 0 : i32
    return %arg0, %c0_i32, %c0_i32_0 : i32, i32, i32
  }
  func.func @transform_3(%arg0: i32) -> (i32, i32) {
    %c0_i32 = arith.constant 0 : i32
    %c0_i32_0 = arith.constant 0 : i32
    %c0_i32_1 = arith.constant 0 : i32
    return %c0_i32, %c0_i32_0 : i32, i32
  }
  func.func @transform_4(%arg0: i32) -> (i32, i32) {
    %c0_i32 = arith.constant 0 : i32
    %c0_i32_0 = arith.constant 0 : i32
    %c0_i32_1 = arith.constant 0 : i32
    return %c0_i32, %c0_i32_0 : i32, i32
  }
  func.func @transform_5(%arg0: i32) -> (i32, i32) {
    %c0_i32 = arith.constant 0 : i32
    %c0_i32_0 = arith.constant 0 : i32
    %c0_i32_1 = arith.constant 0 : i32
    return %c0_i32, %c0_i32_0 : i32, i32
  }
  func.func @transform_6(%arg0: i32) -> (i32, i32) {
    %c0_i32 = arith.constant 0 : i32
    %c0_i32_0 = arith.constant 0 : i32
    %c0_i32_1 = arith.constant 0 : i32
    return %c0_i32, %c0_i32_0 : i32, i32
  }
  func.func @transform_7(%arg0: i32) -> (i32, i32) {
    %c0_i32 = arith.constant 0 : i32
    %c0_i32_0 = arith.constant 0 : i32
    %c0_i32_1 = arith.constant 0 : i32
    return %c0_i32, %c0_i32_0 : i32, i32
  }
  func.func @transform_8(%arg0: i32) -> (i32, i32) {
    %c0_i32 = arith.constant 0 : i32
    %c0_i32_0 = arith.constant 0 : i32
    %c0_i32_1 = arith.constant 0 : i32
    return %c0_i32, %c0_i32_0 : i32, i32
  }
  func.func @transform_9(%arg0: i32) -> (i32, i32) {
    %c0_i32 = arith.constant 0 : i32
    %c0_i32_0 = arith.constant 0 : i32
    %c0_i32_1 = arith.constant 0 : i32
    return %c0_i32, %c0_i32_0 : i32, i32
  }
  func.func @transform_10(%arg0: i32) -> (i32, i32) {
    %c0_i32 = arith.constant 0 : i32
    %c0_i32_0 = arith.constant 0 : i32
    %c0_i32_1 = arith.constant 0 : i32
    return %c0_i32, %c0_i32_0 : i32, i32
  }
  func.func @transform_11(%arg0: i32) -> (i32, i32, i32) {
    %c0_i32 = arith.constant 0 : i32
    %c0_i32_0 = arith.constant 0 : i32
    %c0_i32_1 = arith.constant 0 : i32
    return %arg0, %c0_i32, %c0_i32_0 : i32, i32, i32
  }
}

</mosaic_0001>

<bundles_post_ra>
// kernel: tpu_custom_call.1
= control target key start
LH: loop header
LB: loop body
LE: loop exit
PB: predicated region body
PF: predicated region fallthrough
CT: control target
= control target key end

     0   :  { %s2954_s0 = inlined_call_operand.hbm [shape: f32[2,8,32], index: 0, kind: input, shape index: {}]   ;;  %s2955_s1 = inlined_call_operand.hbm [shape: f32[2,8,32], index: 1, kind: input, shape index: {}]   ;;  %s2956_s2 = inlined_call_operand.hbm [shape: f32[2,8,32], index: 2, kind: input, shape index: {}]   ;;  %s2957_s3 = inlined_call_operand.hbm [shape: f32[32,32], index: 3, kind: input, shape index: {}]   ;;  %s2958_s4 = inlined_call_operand.vmem [shape: f32[1,32], index: 4, kind: input, shape index: {}]   ;;  %s2959_s5 = inlined_call_operand.hbm [shape: f32[32,32], index: 5, kind: input, shape index: {}]   ;;  %s2960_s6 = inlined_call_operand.vmem [shape: f32[1,32], index: 6, kind: input, shape index: {}]   ;;  %s2961_s7 = inlined_call_operand.hbm [shape: f32[32,32], index: 7, kind: input, shape index: {}]   ;;  %s2962_s8 = inlined_call_operand.hbm [shape: f32[1,32], index: 8, kind: input, shape index: {}]   ;;  %s2963_s9 = inlined_call_operand.vmem [shape: f32[32,32], index: 9, kind: input, shape index: {}]   ;;  %s2964_s10 = inlined_call_operand.vmem [shape: f32[1,32], index: 10, kind: input, shape index: {}]   ;;  %s2965_s11 = inlined_call_operand.hbm [shape: f32[2,8,32], index: 11, kind: output, shape index: {}]  }
   0x1   :  { %2990 = sst [smem:[#allocation26_spill]] %s2955_s1 }
   0x2   :  { %2991 = sst [smem:[#allocation27_spill]] %s2957_s3 }
   0x3   :  { %2992 = sst [smem:[#allocation28_spill]] %s2958_s4 }
   0x4   :  { %2993 = sst [smem:[#allocation29_spill]] %s2961_s7 }
   0x5   :  { %2994 = sst [smem:[#allocation30_spill]] %s2963_s9 }
   0x6   :  { %2995 = sst [smem:[#allocation31_spill]] %s2964_s10 }
   0x7   :  { %2996 = sst [smem:[#allocation32_spill]] %s2965_s11 }
   0x8   :  { %16 = vsyncpa [#allocation3], 0 }
   0x9   :  { %18 = vsyncpa [#allocation3 + $0x1], 0 }
   0xa   :  { %19 = vsyncpa [#allocation6], 0 }
   0xb   :  { %21 = vsyncpa [#allocation6 + $0x1], 0 }
   0xc   :  { %22 = vsyncpa [#allocation9], 0 }
   0xd   :  { %23 = vsyncpa [#allocation12], 0 }
   0xe   :  { %24 = vsyncpa [#allocation4], 0 }
   0xf   :  { %26 = vsyncpa [#allocation4 + $0x1], 0  ;;  %s2457_s17 = smov 0   ;;  %s2459_s18 = smov 0  }
  0x10   :  { %s2461_s19 = smov 0   ;;  %s2463_s20 = smov 0  }
  0x11 LB: > { %2997 = sst [smem:[#allocation20_spill]] %s2364_s17  ;;  %s2378_s21 = smov [#allocation8]   ;;  %s2376_s20 = sphi %s2463_s20, %s3041_s20   ;;  %s2372_s19 = sphi %s2461_s19, %s3045_s19   ;;  %s2368_s18 = sphi %s2459_s18, %s3044_s18   ;;  %s2364_s17 = sphi %s2457_s17, %s3043_s17  }
  0x12   : > { %2998 = sst [smem:[#allocation21_spill]] %s2376_s20  ;;  %s321_s22 = sshll.u32 %s2378_s21, 4  ;;  %s2483_s22 = int_to_ptr.vmem [resolvable:$true] %s321_s22 }
  0x13   : > { %s2478_s23 = sadd.s32 4294967295, %s2376_s20   ;;  %p1759_p0 = scmp.ge.s32.totalorder %s2376_s20, 1 }
  0x14   : > { %p2976_p1 = scmp.eq.s32.totalorder %s2478_s23, 0  ;;  %p309_p2 = scmp.lt.s32.totalorder %s2376_s20, 3 }
  0x15   : > { %s2379_s25 = smov [#allocation11]   ;;  %s3001_s3 = sld [smem:[#allocation27_spill]] }
  0x16   : > { %p2485_p3 = pnand %p1759_p0, %p309_p2  ;;  %s353_s26 = sshll.u32 %s2379_s25, 4  ;;  %s2498_s26 = int_to_ptr.vmem [resolvable:$true] %s353_s26 }
  0x18   : > { %s2999_s24 = scalar_select %p2485_p3, 1, 0 }
  0x19   : > { %p1996_p5 = pneg %p2485_p3 }
  0x1b   : > { %p2494_p6 = pnand %p1996_p5, %p2976_p1  ;;  %s2096_s30 = scalar_lea.hbm %s3001_s3, 512 }
  0x1c   : > { %p2097_p7 = scmp.ne.s32.totalorder %s3001_s3, %s2096_s30  ;;  %p2103_p11 = scmp.lt.u32.totalorder %s2096_s30, %s3001_s3 }
  0x1d   : > { %s3000_s27 = scalar_select %p2494_p6, 1, 0 }
  0x1e   : > { %p2508_p8 = pneg %p2494_p6 }
  0x20   : > { %s3002_s14 = scalar_select %p2508_p8, 1, 0 }
  0x21   : > { %p2099_p9 = pnand %p2508_p8, %p2097_p7 }
  0x23   : > { %p2100_p10 = pneg %p2099_p9 }
  0x25   : > { %p2105_p12 = pnand %p2103_p11, %p2100_p10 }
  0x27   : > { %2108 = shalt.err (!%p2105_p12)
}
  0x28   : > { %s2109_s21 = scalar_lea.vmem %s2483_s22, 512  ;;  %p2117_p5 = scmp.lt.s32.totalorder %s2483_s22, %s2483_s22 }
  0x29   : > { %p2110_p13 = scmp.ne.s32.totalorder %s2483_s22, %s2109_s21  ;;  %p2118_p4 = scmp.lt.s32.totalorder %s2109_s21, %s2109_s21 }
  0x2b   : > { %p2112_p0 = pnand %p2110_p13, %p2508_p8  ;;  %p2119_p7 = por %p2118_p4, %p2117_p5 }
  0x2d   : > { %p2113_p2 = pneg %p2112_p0 }
  0x2f   : > { %p2120_p9 = pnand %p2119_p7, %p2113_p2 }
  0x31   : > { %2123 = shalt.err (!%p2120_p9)
}
  0x32   : > { %s2968_s25 = smov 128   ;;  %s2969_s28 = smov 8  }
  0x33   : > { %1999 = dma.hbm_to_vmem [thread:$0]  (!%p2494_p6), %s3001_s3, 512, %s2483_s22, [#allocation9], %s2968_s25, %s2968_s25, %s2969_s28  }
  0x34   : > { %s3003_s7 = sld [smem:[#allocation29_spill]] }
  0x3a   : > { %s2124_s15 = scalar_lea.hbm %s3003_s7, 512 }
  0x3b   : > { %p2125_p4 = scmp.ne.s32.totalorder %s3003_s7, %s2124_s15  ;;  %p2131_p12 = scmp.lt.u32.totalorder %s2124_s15, %s3003_s7 }
  0x3d   : > { %p2127_p10 = pnand %p2125_p4, %p2508_p8 }
  0x3f   : > { %p2128_p11 = pneg %p2127_p10 }
  0x41   : > { %p2133_p13 = pnand %p2131_p12, %p2128_p11 }
  0x43   : > { %2136 = shalt.err (!%p2133_p13)
}
  0x44   : > { %s2137_s22 = scalar_lea.vmem %s2498_s26, 512  ;;  %p2145_p7 = scmp.lt.s32.totalorder %s2498_s26, %s2498_s26 }
  0x45   : > { %p2138_p0 = scmp.ne.s32.totalorder %s2498_s26, %s2137_s22  ;;  %p2146_p9 = scmp.lt.s32.totalorder %s2137_s22, %s2137_s22 }
  0x47   : > { %p2140_p2 = pnand %p2138_p0, %p2508_p8  ;;  %p2147_p4 = por %p2146_p9, %p2145_p7 }
  0x49   : > { %p2141_p5 = pneg %p2140_p2 }
  0x4b   : > { %p2148_p10 = pnand %p2147_p4, %p2141_p5 }
  0x4d   : > { %2151 = shalt.err (!%p2148_p10)
}
  0x4e   : > { %2005 = dma.hbm_to_vmem [thread:$0]  (!%p2494_p6), %s3003_s7, 512, %s2498_s26, [#allocation12], %s2968_s25, %s2968_s25, %s2969_s28  }
  0x4f   : > { %s1758_s29 = sadd.s32 4294967294, %s2376_s20   ;;  %s2560_s30 = sadd.s32 1, %s2376_s20  }
  0x50   : > { %3004 = sst [smem:[#allocation22_spill]] %s2560_s30  ;;  %s36_s12 = ssub.s32 %s2376_s20, %s2560_s30 }
  0x51   : > { %s39_s13 = sadd.s32 1, %s2372_s19  ;;  %p37_p11 = scmp.eq.s32.totalorder %s36_s12, 0 }
  0x52   : > { %p46_p12 = scmp.ne.s32.totalorder %s2372_s19, %s2368_s18  ;;  %p47_p13 = scmp.eq.s32.totalorder %s2376_s20, 0 }
  0x53   : > { %p52_p0 = scmp.ne.s32.totalorder %s2368_s18, %s2364_s17  ;;  %p296_p7 = scmp.eq.s32.totalorder %s2478_s23, 1 }
  0x54   : > { %s2571_s15 = scalar_select %p37_p11, %s2372_s19, %s39_s13  }
  0x55   : > { %p48_p2 = por %p47_p13, %p46_p12  ;;  %p2575_p5 = por %p2976_p1, %p52_p0 }
  0x56   : > { %3005 = sst [smem:[#allocation23_spill]] %s2571_s15  ;;  %p302_p9 = scmp.eq.s32.totalorder %s1758_s29, 1 }
  0x57   : > { %s3006_s16 = scalar_select %p2575_p5, 1, 0 }
  0x58   : > { %p2027_p4 = scmp.lt.s32.totalorder %s2376_s20, 2  ;;  %s2970_s26 = sand.u32 1, %s2372_s19  }
  0x59   : > { %p2582_p10 = por %p296_p7, %p46_p12  ;;  %p2586_p3 = por %p302_p9, %p52_p0 }
  0x5a   : > { %s2592_s10 = sshll.u32 %s2970_s26, 3  ;;  %s2595_s11 = sshll.u32 %s2376_s20, 7 }
  0x5b   : > { %s3007_s21 = scalar_select %p2582_p10, 1, 0 }
  0x5c   : > { %s3009_s22 = scalar_select %p2586_p3, 1, 0 }
  0x5d   : > { %3008 = sst [smem:[#allocation24_spill]] %s3007_s21  ;;  %p2597_p11 = pnand %p2027_p4, %p48_p2 }
  0x5e   : > { %3010 = sst [smem:[#allocation25_spill]] %s3009_s22  ;;  %s402_s29 = sand.u32 1, %s2376_s20  }
  0x5f   : > { %s3011_s12 = scalar_select %p2597_p11, 1, 0 }
  0x60   : > { %s3012_s1 = sld [smem:[#allocation26_spill]]  ;;  %s406_s26 = scalar_lea.vmem [#allocation5], %s2592_s10 }
  0x61   : > { %s413_s3 = sshll.u32 %s406_s26, 4  ;;  %s2382_s7 = smov [#allocation10]   ;;  %s2609_s3 = int_to_ptr.vmem [resolvable:$true] %s413_s3 }
  0x62   : > { %s2611_s15 = sshll.u32 %s2382_s7, 4  ;;  %s2613_s30 = scalar_lea.sflag [#allocation6], %s402_s29  ;;  %s338_s15 = int_to_ptr.vmem [resolvable:$true] %s2611_s15 }
  0x63   : > { %p2619_p13 = pneg %p2597_p11 }
  0x65   : > { %s3013_s25 = scalar_select %p2619_p13, 1, 0 }
  0x66   : > { %s2606_s28 = scalar_lea.hbm %s3012_s1, %s2595_s11  ;;  %s2157_s20 = scalar_lea.hbm %s3012_s1, 256 }
  0x67   : > { %s2152_s22 = scalar_lea.hbm %s2606_s28, 128  ;;  %p2158_p7 = scmp.lt.u32.totalorder %s2606_s28, %s3012_s1 }
  0x68   : > { %p2153_p12 = scmp.ne.s32.totalorder %s2606_s28, %s2152_s22  ;;  %p2159_p9 = scmp.lt.u32.totalorder %s2157_s20, %s2152_s22 }
  0x69   : > { %p2161_p1 = scmp.lt.u32.totalorder %s2152_s22, %s2606_s28 }
  0x6a   : > { %p2155_p0 = pnand %p2619_p13, %p2153_p12  ;;  %p2160_p4 = por %p2159_p9, %p2158_p7 }
  0x6c   : > { %p2156_p2 = pneg %p2155_p0  ;;  %p2162_p3 = por %p2161_p1, %p2160_p4 }
  0x6e   : > { %p2163_p10 = pnand %p2162_p3, %p2156_p2 }
  0x70   : > { %2166 = shalt.err (!%p2163_p10)
}
  0x71   : > { %s2167_s29 = scalar_lea.vmem %s2609_s3, 128  ;;  %s2383_s13 = smov [#allocation5]  }
  0x72   : > { %p2168_p12 = scmp.ne.s32.totalorder %s2609_s3, %s2167_s29  ;;  %s2172_s26 = sshll.u32 %s2383_s13, 4  ;;  %s2173_s26 = int_to_ptr.vmem [resolvable:$false] %s2172_s26 }
  0x73   : > { %s2174_s17 = scalar_lea.vmem %s2173_s26, 256  ;;  %p2175_p6 = scmp.lt.s32.totalorder %s2609_s3, %s2173_s26 }
  0x74   : > { %p2170_p0 = pnand %p2168_p12, %p2619_p13  ;;  %p2176_p8 = scmp.lt.s32.totalorder %s2174_s17, %s2167_s29 }
  0x76   : > { %p2171_p5 = pneg %p2170_p0  ;;  %p2177_p7 = por %p2176_p8, %p2175_p6 }
  0x78   : > { %p2178_p9 = pnand %p2177_p7, %p2171_p5 }
  0x7a   : > { %2181 = shalt.err (!%p2178_p9)
}
  0x7b   : > { %2015 = dma.hbm_to_vmem [thread:$0]  (!%p2597_p11), %s2606_s28, 128, %s2609_s3, %s2613_s30  }
  0x7c   : > { %s2182_s7 = scalar_lea.hbm %s2959_s5, 512  ;;  %p3014_p3 = scmp.ne.s32.totalorder %s3002_s14, 0 }
  0x7d   : > { %p2183_p1 = scmp.ne.s32.totalorder %s2959_s5, %s2182_s7  ;;  %p2189_p5 = scmp.lt.u32.totalorder %s2182_s7, %s2959_s5 }
  0x7f   : > { %p2185_p6 = pnand %p2183_p1, %p3014_p3 }
  0x81   : > { %p2186_p8 = pneg %p2185_p6 }
  0x83   : > { %p2191_p10 = pnand %p2189_p5, %p2186_p8 }
  0x85   : > { %2194 = shalt.err (!%p2191_p10)
}
  0x86   : > { %s2195_s17 = scalar_lea.vmem %s338_s15, 512  ;;  %p2203_p0 = scmp.lt.s32.totalorder %s338_s15, %s338_s15 }
  0x87   : > { %p2196_p2 = scmp.ne.s32.totalorder %s338_s15, %s2195_s17  ;;  %p2204_p7 = scmp.lt.s32.totalorder %s2195_s17, %s2195_s17 }
  0x89   : > { %p2198_p4 = pnand %p2196_p2, %p3014_p3  ;;  %p2205_p9 = por %p2204_p7, %p2203_p0 }
  0x8b   : > { %p2199_p12 = pneg %p2198_p4 }
  0x8d   : > { %p2206_p11 = pnand %p2205_p9, %p2199_p12 }
  0x8f   : > { %2209 = shalt.err (!%p2206_p11)
}
  0x90   : > { %p3015_p1 = scmp.ne.s32.totalorder %s3000_s27, 0  ;;  %s3016_s1 = smov 8  }
  0x91   : > { %s3017_s3 = smov 128   ;;  %s2384_s22 = smov [#allocation13]  }
  0x92   : > { %2002 = dma.hbm_to_vmem [thread:$0]  (!%p3015_p1), %s2959_s5, 512, %s338_s15, [#allocation9], %s3017_s3, %s3017_s3, %s3016_s1  }
  0x93   : > { %s367_s7 = sshll.u32 %s2384_s22, 4  ;;  %s2210_s26 = scalar_lea.hbm %s2962_s8, 16  ;;  %s368_s7 = int_to_ptr.vmem [resolvable:$true] %s367_s7 }
  0x94   : > { %p2211_p11 = scmp.ne.s32.totalorder %s2962_s8, %s2210_s26  ;;  %p2217_p5 = scmp.lt.u32.totalorder %s2210_s26, %s2962_s8 }
  0x96   : > { %p2213_p6 = pnand %p2211_p11, %p3014_p3 }
  0x98   : > { %p2214_p8 = pneg %p2213_p6 }
  0x9a   : > { %p2219_p10 = pnand %p2217_p5, %p2214_p8 }
  0x9c   : > { %2222 = shalt.err (!%p2219_p10)
}
  0x9d   : > { %s2223_s15 = scalar_lea.vmem %s368_s7, 16  ;;  %s2230_s1 = scalar_lea.vmem %s368_s7, 32 }
  0x9e   : > { %p2224_p2 = scmp.ne.s32.totalorder %s368_s7, %s2223_s15  ;;  %p2231_p0 = scmp.lt.s32.totalorder %s368_s7, %s368_s7 }
  0x9f   : > { %p2232_p7 = scmp.lt.s32.totalorder %s2230_s1, %s2223_s15 }
  0xa0   : > { %p2226_p4 = pnand %p2224_p2, %p3014_p3 }
  0xa1   : > { %p2233_p9 = por %p2232_p7, %p2231_p0 }
  0xa2   : > { %p2227_p12 = pneg %p2226_p4 }
  0xa4   : > { %p2234_p13 = pnand %p2233_p9, %p2227_p12 }
  0xa6   : > { %2237 = shalt.err (!%p2234_p13)
}
  0xa7   : > { %2008 = dma.hbm_to_vmem [thread:$0]  (!%p3015_p1), %s2962_s8, 16, %s368_s7, [#allocation12]  }
  0xa8   : > { %s2687_s14 = scalar_lea.hbm %s2954_s0, %s2595_s11  ;;  %s388_s28 = scalar_lea.vmem [#allocation2], %s2592_s10 }
  0xa9   : > { %s395_s20 = sshll.u32 %s388_s28, 4  ;;  %s3018_s27 = sand.u32 1, %s2372_s19   ;;  %s396_s20 = int_to_ptr.vmem [resolvable:$true] %s395_s20 }
  0xaa   : > { %s385_s22 = scalar_lea.sflag [#allocation3], %s3018_s27  ;;  %s2238_s13 = scalar_lea.hbm %s2687_s14, 128 }
  0xab   : > { %p2239_p13 = scmp.ne.s32.totalorder %s2687_s14, %s2238_s13  ;;  %p3019_p3 = scmp.ne.s32.totalorder %s3013_s25, 0 }
  0xac   : > { %s2243_s26 = scalar_lea.hbm %s2954_s0, 256  ;;  %p2244_p1 = scmp.lt.u32.totalorder %s2687_s14, %s2954_s0 }
  0xad   : > { %p2241_p11 = pnand %p2239_p13, %p3019_p3  ;;  %p2245_p8 = scmp.lt.u32.totalorder %s2243_s26, %s2238_s13 }
  0xae   : > { %p2247_p10 = scmp.lt.u32.totalorder %s2238_s13, %s2687_s14 }
  0xaf   : > { %p2242_p6 = pneg %p2241_p11  ;;  %p2246_p5 = por %p2245_p8, %p2244_p1 }
  0xb1   : > { %p2248_p2 = por %p2247_p10, %p2246_p5 }
  0xb3   : > { %p2249_p4 = pnand %p2248_p2, %p2242_p6 }
  0xb5   : > { %2252 = shalt.err (!%p2249_p4)
}
  0xb6   : > { %s2253_s1 = scalar_lea.vmem %s396_s20, 128  ;;  %s2385_s21 = smov [#allocation2]  }
  0xb7   : > { %p2254_p12 = scmp.ne.s32.totalorder %s396_s20, %s2253_s1  ;;  %s2258_s3 = sshll.u32 %s2385_s21, 4  ;;  %s2259_s3 = int_to_ptr.vmem [resolvable:$false] %s2258_s3 }
  0xb8   : > { %s2260_s4 = scalar_lea.vmem %s2259_s3, 256  ;;  %p2261_p9 = scmp.lt.s32.totalorder %s396_s20, %s2259_s3 }
  0xb9   : > { %p2256_p0 = pnand %p2254_p12, %p3019_p3  ;;  %p2262_p13 = scmp.lt.s32.totalorder %s2260_s4, %s2253_s1 }
  0xbb   : > { %p2257_p7 = pneg %p2256_p0  ;;  %p2263_p11 = por %p2262_p13, %p2261_p9 }
  0xbd   : > { %p2264_p1 = pnand %p2263_p11, %p2257_p7 }
  0xbf   : > { %2267 = shalt.err (!%p2264_p1)
}
  0xc0   : > { %p3020_p8 = scmp.ne.s32.totalorder %s3011_s12, 0  ;;  %s2713_s27 = scalar_lea.hbm %s2956_s2, %s2595_s11 }
  0xc1   : > { %s424_s13 = scalar_lea.vmem [#allocation7], %s2592_s10  ;;  %s2268_s29 = scalar_lea.hbm %s2713_s27, 128 }
  0xc2   : > { %2012 = dma.hbm_to_vmem [thread:$0]  (!%p3020_p8), %s2687_s14, 128, %s396_s20, %s385_s22  }
  0xc3   : > { %s431_s7 = sshll.u32 %s424_s13, 4  ;;  %p2269_p6 = scmp.ne.s32.totalorder %s2713_s27, %s2268_s29  ;;  %s432_s7 = int_to_ptr.vmem [resolvable:$true] %s431_s7 }
  0xc4   : > { %s2273_s14 = scalar_lea.hbm %s2956_s2, 256  ;;  %p2274_p2 = scmp.lt.u32.totalorder %s2713_s27, %s2956_s2 }
  0xc5   : > { %p2271_p5 = pnand %p2269_p6, %p3019_p3  ;;  %p2275_p4 = scmp.lt.u32.totalorder %s2273_s14, %s2268_s29 }
  0xc6   : > { %p2277_p0 = scmp.lt.u32.totalorder %s2268_s29, %s2713_s27 }
  0xc7   : > { %p2272_p10 = pneg %p2271_p5  ;;  %p2276_p12 = por %p2275_p4, %p2274_p2 }
  0xc9   : > { %p2278_p7 = por %p2277_p0, %p2276_p12 }
  0xcb   : > { %p2279_p9 = pnand %p2278_p7, %p2272_p10 }
  0xcd   : > { %2282 = shalt.err (!%p2279_p9)
}
  0xce   : > { %s2283_s10 = scalar_lea.vmem %s432_s7, 128  ;;  %s2386_s11 = smov [#allocation7]  }
  0xcf   : > { %p2284_p13 = scmp.ne.s32.totalorder %s432_s7, %s2283_s10  ;;  %s2288_s15 = sshll.u32 %s2386_s11, 4  ;;  %s2289_s15 = int_to_ptr.vmem [resolvable:$false] %s2288_s15 }
  0xd0   : > { %s2290_s1 = scalar_lea.vmem %s2289_s15, 256  ;;  %p2291_p6 = scmp.lt.s32.totalorder %s432_s7, %s2289_s15 }
  0xd1   : > { %p2286_p11 = pnand %p2284_p13, %p3019_p3  ;;  %p2292_p5 = scmp.lt.s32.totalorder %s2290_s1, %s2283_s10 }
  0xd3   : > { %p2287_p1 = pneg %p2286_p11  ;;  %p2293_p8 = por %p2292_p5, %p2291_p6 }
  0xd5   : > { %p2294_p2 = pnand %p2293_p8, %p2287_p1 }
  0xd7   : > { %2297 = shalt.err (!%p2294_p2)
}
  0xd8   : > { %p3021_p4 = scmp.ne.s32.totalorder %s3011_s12, 0  ;;  %p3022_p10 = scmp.ne.s32.totalorder %s2999_s24, 0 }
  0xd9   : > { %s2737_s25 = sand.u32 (!%p3022_p10), 1, %s2368_s18   ;;  %p3023_p3 = scmp.ne.s32.totalorder (!%p3022_p10), %s3006_s16, 0 }
  0xda   : > { %2018 = dma.hbm_to_vmem [thread:$0]  (!%p3021_p4), %s2713_s27, 128, %s432_s7, %s2613_s30  }
  0xdb   : > { %440 = sbr.rel (%p3022_p10) target bundleno = 3143 (0xc47), region = 64  ;;  %s2740_s21 = sshll.u32 (!%p3022_p10), %s2737_s25, 3 }
  0xdc   : > { %s443_s3 = scalar_lea.sflag (!%p3022_p10), [#allocation3], %s2737_s25  ;;  %s446_s4 = scalar_lea.vmem (!%p3022_p10), [#allocation2], %s2740_s21 }
  0xe2   : > { %2343 = dma.done.wait (%p3023_p3), %s443_s3, 128  }
  0xe3   : > { %2345 = vsyncadd (%p3023_p3), %s443_s3, 4294967168  ;;  %s451_s24 = sand.u32 1, %s2478_s23   ;;  %s455_s12 = scalar_lea.vmem [#allocation5], %s2740_s21 }
  0xe4   : > { %s452_s30 = scalar_lea.sflag [#allocation6], %s451_s24 }
  0xe5   : > { %2347 = dma.done.wait (%p3023_p3), %s452_s30, 256  }
  0xe6   : > { %2349 = vsyncadd (%p3023_p3), %s452_s30, 4294967040  ;;  %s464_s9 = scalar_lea.vmem [#allocation7], %s2740_s21  ;;  %p3024_p8 = scmp.eq.s32.totalorder %s2478_s23, 0 }
  0xe8   : > { %2351 = dma.done.wait (%p3024_p8), [#allocation9], 1024   ;;  %p3025_p12 = pmov %p3024_p8 }
  0xe9   : > { %p3026_p0 = pmov %p3024_p8 }
  0xea   : > { %2353 = vsyncadd (%p3025_p12), [#allocation9], 4294966272 }
  0xeb   : > { %2355 = dma.done.wait (%p3026_p0), [#allocation12], 528   ;;  %p3027_p7 = pmov %p3026_p0 }
  0xec   : > { %v2387_v0 = vmov 0.0|0.0   ;;  %vm2388_vm0 = vmmov 0   ;;  %v2389_v1 = vmov 0.0   ;;  %vm543_vm1 = vcmask 261120   ;;  %v629_v3 = vld [vmem:[#allocation10] sm:$0xff]  ;;  %v630_v4 = vld [vmem:[#allocation10 + $0x8] sm:$0xff] }
  0xed   : > { %2357 = vsyncadd (%p3027_p7), [#allocation12], 4294966768  ;;  %1948 = vmatprep.subr.bf16.mxu1 %v2387_v0  ;;  %1940 = vmatprep.subr.bf16.mxu0 %v2387_v0  ;;  %v532_v5 = vld [vmem:[#allocation8] sm:$0xff]  ;;  %v1949_v6 = vpack.c.bf16 %v630_v4, %v629_v3  ;;  %v533_v7 = vld [vmem:[#allocation8 + $0x8] sm:$0xff]  ;;  %s3030_s7 = sld [smem:[#allocation28_spill]]  ;;  %vm822_vm3 = vcmask 64512  }
  0xee   : > { %1875 = vmatprep.mubr.msk.f32.mxu1 %vm2388_vm0, %v2389_v1  ;;  %1864 = vmatprep.mubr.msk.f32.mxu0 %vm2388_vm0, %v2389_v1  ;;  %vm2771_vm2 = vmpackc.low %vm543_vm1, %vm543_vm1  ;;  %v1941_v8 = vpack.c.bf16 %v533_v7, %v532_v5  ;;  %v631_v9 = vld [vmem:[#allocation10 + $0x10] sm:$0xff]  ;;  %v632_v10 = vld [vmem:[#allocation10 + $0x18] sm:$0xff]  ;;  %s2390_s29 = smov 120   ;;  %s2391_s26 = smov 112   ;;  %vm1492_vm4 = vcmask 130048   ;;  %vm1494_vm5 = vcmask 195584  }
  0xef   : > { %1951 = vmatpush3.bf16.xpose.msk.msra.mxu1 %vm2771_vm2, %v1949_v6  ;;  %v534_v11 = vld [vmem:[#allocation8 + $0x10] sm:$0xff]  ;;  %v535_v12 = vld [vmem:[#allocation8 + $0x18] sm:$0xff]  ;;  %v1953_v13 = vpack.c.bf16 %v632_v10, %v631_v9  ;;  %v530_v15 = vld [vmem:[%s455_s12] sm:$0xff]  ;;  %s2392_s17 = smov 104   ;;  %s2393_s14 = smov 8  }
  0xf0   : > { %1943 = vmatpush3.bf16.xpose.msk.msra.mxu0 %vm2771_vm2, %v1941_v8  ;;  %1952 = vmatprep.subr.bf16.mxu1 %v2387_v0  ;;  %v1945_v14 = vpack.c.bf16 %v535_v12, %v534_v11  ;;  %v529_v16 = vld [vmem:[%s446_s4] sm:$0xff]  ;;  %v725_v26 = vld [vmem:[#allocation11] sm:$0xff]  ;;  %v726_v27 = vld [vmem:[#allocation11 + $0x8] sm:$0xff]  ;;  %s2394_s20 = smov 16   ;;  %s3031_s11 = sld [smem:[#allocation30_spill]] }
  0xf1   : > { %1944 = vmatprep.subr.bf16.mxu0 %v2387_v0  ;;  %v1786_v17 = vld [vmem:[%s2960_s6] ss:$0 sm:$0xff]  ;;  %v1957_v28 = vpack.c.bf16 %v726_v27, %v725_v26  ;;  %v728_v30 = vld [vmem:[#allocation11 + $0x18] sm:$0xff]  ;;  %v1792_v41 = vld [vmem:[#allocation13] ss:$0 sm:$0xff]  ;;  %s2395_s12 = smov 24  }
  0xf2   : > { %v727_v29 = vld [vmem:[#allocation11 + $0x10] sm:$0xff]  ;;  %s3033_s27 = sld [smem:[#allocation31_spill]]  ;;  %s1817_s13 = sshll.u32 %s2478_s23, 7 }
  0xf3   : > { %v1780_v18 = vld [vmem:[%s3030_s7] ss:$0 sm:$0xff]  ;;  %v1961_v31 = vpack.c.bf16 %v728_v30, %v727_v29  ;;  %s528_s7 = scalar_lea.vmem [#allocation14], %s2740_s21  ;;  %s1594_s22 = scalar_lea.sflag [#allocation4], %s2737_s25 }
  0xf4   : > { %v531_v32 = vld [vmem:[%s464_s9] sm:$0xff]  ;;  %s3032_s9 = sld [smem:[#allocation24_spill]]  ;;  %s2396_s23 = smov [#allocation14]  }
  0xf5   : > { %s2302_s21 = sshll.u32 %s2396_s23, 4  ;;  %s2303_s21 = int_to_ptr.vmem [resolvable:$false] %s2302_s21 }
  0xf6   : > { %s2304_s15 = scalar_lea.vmem %s2303_s21, 256 }
  0xf7   : > { %1955 = vmatpush3.bf16.xpose.msk.msra.mxu1 %vm2771_vm2, %v1953_v13 }
  0xf8   : > { %1947 = vmatpush3.bf16.xpose.msk.msra.mxu0 %vm2771_vm2, %v1945_v14  ;;  %1889 = vmatprep.subr.mxu1 %v2389_v1  ;;  %v1810_v2 = vld [vmem:[%s3033_s27] ss:$0 sm:$0xff] }
  0xf9   : > { %1956 = vmatprep.subr.bf16.mxu0 %v2387_v0 }
  0xfa   : > { %p3035_p13 = scmp.ne.s32.totalorder %s3032_s9, 0 }
  0xfe   : > { %1876 = vmatmul.mubr.msk.f32.vlgmr.msra.gmra.mrb[0].mxu1 %vm543_vm1, %v530_v15 }
  0xff   : > { %1865 = vmatmul.mubr.msk.f32.vlgmr.msra.gmra.mrb[0].mxu0 %vm543_vm1, %v529_v16  ;;  %1891 = vmatprep.mubr.msk.f32.mxu1 %vm2388_vm0, %v2389_v1 }
 0x100   : > { %1886 = vmatprep.mubr.msk.f32.mxu0 %vm2388_vm0, %v2389_v1  ;;  %1959 = vmatpush3.bf16.xpose.msk.msra.mxu0 %vm2771_vm2, %v1957_v28 }
 0x101   : > { %1960 = vmatprep.subr.bf16.mxu0 %v2387_v0 }
 0x108   : > { %1963 = vmatpush3.bf16.xpose.msk.msra.mxu0 %vm2771_vm2, %v1961_v31 }
 0x109   : > { %1964 = vmatprep.subr.bf16.mxu0 %v2387_v0 }
 0x10f   : > { %1887 = vmatmul.mubr.msk.f32.vlgmr.msra.gmra.mrb[2].mxu0 %vm543_vm1, %v531_v32 }
 0x110   : > { %1937 = vmatprep.mubr.msk.f32.mxu0 %vm2388_vm0, %v2389_v1 }
 0x1d1   : > { %v721_v19 = vpop.f32.mrb[0].mxu1 }
 0x1d2   : > { %v2803_v20 = vadd.f32 %v1786_v17, %v721_v19  ;;  %v625_v21 = vpop.f32.mrb[0].mxu0  ;;  %v1877_v22 = vpop.f32.mrb[1].mxu1 }
 0x1d3   : > { %v626_v23 = vadd.f32 %v1780_v18, %v625_v21  ;;  %v1866_v24 = vpop.f32.mrb[1].mxu0 }
 0x1d4   : > { %985 = vrot.lane.b32.xlu1 %v2803_v20, %s2390_s29  ;;  %1890 = vmatpush3.xpose.msk.msra.mxu1 %vm822_vm3, %v2803_v20 }
 0x1d5   : > { %v2809_v25 = vmul.f32 0.35355338, %v626_v23  ;;  %1894 = vmatprep.subr.mxu1 %v2389_v1 }
 0x1d7   : > { %1892 = vmatmul.mubr.msk.f32.vlgmr.msra.gmra.mrb[2].mxu1 %vm822_vm3, %v2809_v25 }
 0x1d8   : > { %983 = vrot.lane.b32.xlu1 %v2809_v25, %s2390_s29  ;;  %1896 = vmatprep.mubr.msk.f32.mxu1 %vm2388_vm0, %v2389_v1 }
 0x1e2   : > { %v817_v42 = vpop.f32.mrb[2].mxu0 }
 0x1e3   : > { %v2831_v43 = vadd.f32 %v1792_v41, %v817_v42  ;;  %v1888_v44 = vpop.f32.mrb[3].mxu0 }
 0x1e5   : > { %1895 = vmatpush3.msra.mxu1 %v2831_v43 }
 0x1e6   : > { %1899 = vmatprep.subr.mxu1 %v2389_v1 }
 0x246   : > { %v986_v47 = vpop.permute.xlu1 %985 }
 0x24a   : > { %v984_v49 = vpop.permute.xlu1 %983 }
 0x2aa   : > { %v895_v33 = vpop.f32.mrb[2].mxu1 }
 0x2ab   : > { %v1893_v34 = vpop.f32.mrb[3].mxu1  ;;  %v899_v35 = vsel %vm822_vm3, %v895_v33, -inf }
 0x2ac   : > { %900 = vmax.xlane.f32.xlu0 %v899_v35  ;;  %v1496_v34 = vld [vmem:[%s3031_s11] sm:$0xff]  ;;  %v1497_v35 = vld [vmem:[%s3031_s11 + $0x8] sm:$0xff] }
 0x339   : > { %v901_v36 = vpop.xlane.xlu0 %900 }
 0x33a   : > { %v902_v37 = vsub.f32 %v895_v33, %v901_v36  ;;  %v1965_v36 = vpack.c.bf16 %v1497_v35, %v1496_v34 }
 0x33c   : > { %v903_v38 = vmul.f32 1.442695, %v902_v37  ;;  %1967 = vmatpush3.bf16.xpose.msk.msra.mxu0 %vm2771_vm2, %v1965_v36  ;;  %v1498_v37 = vld [vmem:[%s3031_s11 + $0x10] sm:$0xff] }
 0x33d   : > { %1968 = vmatprep.subr.bf16.mxu0 %v2387_v0 }
 0x33e   : > { %2080 = vpow2.f32 %v903_v38  ;;  %v1499_v38 = vld [vmem:[%s3031_s11 + $0x18] sm:$0xff] }
 0x348   : > { %v2081_v39 = vpop.eup %2080 }
 0x349   : > { %v905_v40 = vsel %vm822_vm3, %v2081_v39, 0.0 }
 0x34a   : > { %906 = vadd.xlane.f32.xlu0 %v905_v40 }
 0x3d7   : > { %v907_v45 = vpop.xlane.xlu0 %906 }
 0x3d8   : > { %2082 = vrcp.f32 %v907_v45 }
 0x3e2   : > { %v2083_v46 = vpop.eup %2082 }
 0x3e3   : > { %v909_v48 = vmul.f32 %v2083_v46, %v2081_v39  ;;  %v1969_v39 = vpack.c.bf16 %v1499_v38, %v1498_v37 }
 0x3e5   : > { %1897 = vmatmul.mubr.msk.f32.vlgmr.msra.gmra.mrb[4].mxu1 %vm822_vm3, %v909_v48  ;;  %1971 = vmatpush3.bf16.xpose.msk.msra.mxu0 %vm2771_vm2, %v1969_v39 }
 0x3e6   : > { %1900 = vmatpush3.xpose.msk.msra.mxu1 %vm822_vm3, %v986_v47  ;;  %1901 = vmatprep.mubr.msk.f32.mxu1 %vm2388_vm0, %v2389_v1 }
 0x3e7   : > { %1904 = vmatprep.subr.mxu1 %v2389_v1 }
 0x3e9   : > { %1902 = vmatmul.mubr.msk.f32.vlgmr.msra.gmra.mrb[6].mxu1 %vm822_vm3, %v984_v49 }
 0x3ea   : > { %1906 = vmatprep.mubr.msk.f32.mxu1 %vm2388_vm0, %v2389_v1 }
 0x4b8   : > { %v2843_v50 = vpop.f32.mrb[4].mxu1 }
 0x4b9   : > { %v1898_v51 = vpop.f32.mrb[5].mxu1 }
 0x4bc   : > { %v1057_v52 = vpop.f32.mrb[6].mxu1 }
 0x4bd   : > { %v1903_v53 = vpop.f32.mrb[7].mxu1  ;;  %v1061_v54 = vsel %vm822_vm3, %v1057_v52, -inf }
 0x4be   : > { %1062 = vmax.xlane.f32.xlu0 %v1061_v54 }
 0x4d4   : > { %1073 = vrot.lane.b32.xlu0 %v2831_v43, %s2390_s29  ;;  %s1607_s29 = sshll.u32 %s528_s7, 4  ;;  %s2911_s29 = int_to_ptr.vmem [resolvable:$true] %s1607_s29 }
 0x4d5   : > { %s2298_s10 = scalar_lea.vmem %s2911_s29, 128  ;;  %p2305_p6 = scmp.lt.s32.totalorder %s2911_s29, %s2303_s21 }
 0x4d6   : > { %p2299_p9 = scmp.ne.s32.totalorder %s2911_s29, %s2298_s10  ;;  %p2306_p5 = scmp.lt.s32.totalorder %s2304_s15, %s2298_s10 }
 0x4d8   : > { %1151 = vrot.lane.b32.xlu0 %v2803_v20, %s2391_s26  ;;  %p2300_p11 = pnand %p2299_p9, %p3035_p13  ;;  %p2307_p2 = por %p2306_p5, %p2305_p6 }
 0x4da   : > { %p2301_p1 = pneg %p2300_p11 }
 0x4dc   : > { %1149 = vrot.lane.b32.xlu0 %v2809_v25, %s2391_s26  ;;  %p2308_p4 = pnand %p2307_p2, %p2301_p1 }
 0x54b   : > { %v1063_v55 = vpop.xlane.xlu0 %1062 }
 0x54c   : > { %v1064_v56 = vsub.f32 %v1057_v52, %v1063_v55 }
 0x54e   : > { %v1065_v57 = vmul.f32 1.442695, %v1064_v56 }
 0x54f   : > { %v1074_v58 = vpop.permute.xlu0 %1073 }
 0x550   : > { %2084 = vpow2.f32 %v1065_v57  ;;  %1905 = vmatpush3.msra.mxu1 %v1074_v58 }
 0x551   : > { %1909 = vmatprep.subr.mxu1 %v2389_v1 }
 0x553   : > { %v1152_v63 = vpop.permute.xlu0 %1151 }
 0x557   : > { %v1150_v4 = vpop.permute.xlu0 %1149 }
 0x55a   : > { %v2085_v59 = vpop.eup %2084 }
 0x55b   : > { %v1067_v60 = vsel %vm822_vm3, %v2085_v59, 0.0 }
 0x55c   : > { %1068 = vadd.xlane.f32.xlu1 %v1067_v60 }
 0x56d   : > { %1238 = vrot.lane.b32.xlu1 %v2831_v43, %s2391_s26 }
 0x571   : > { %1316 = vrot.lane.b32.xlu1 %v2803_v20, %s2392_s17 }
 0x5e9   : > { %v1069_v61 = vpop.xlane.xlu1 %1068 }
 0x5ea   : > { %2086 = vrcp.f32 %v1069_v61 }
 0x5ed   : > { %v1239_v5 = vpop.permute.xlu1 %1238 }
 0x5f1   : > { %v1317_v16 = vpop.permute.xlu1 %1316 }
 0x5f4   : > { %v2087_v62 = vpop.eup %2086 }
 0x5f5   : > { %v1071_v3 = vmul.f32 %v2087_v62, %v2085_v59 }
 0x5f7   : > { %1907 = vmatmul.mubr.msk.f32.vlgmr.msra.gmra.mrb[8].mxu1 %vm822_vm3, %v1071_v3 }
 0x5f8   : > { %1910 = vmatpush3.xpose.msk.msra.mxu1 %vm822_vm3, %v1152_v63  ;;  %1911 = vmatprep.mubr.msk.f32.mxu1 %vm2388_vm0, %v2389_v1 }
 0x5f9   : > { %1914 = vmatprep.subr.mxu1 %v2389_v1 }
 0x5fb   : > { %1912 = vmatmul.mubr.msk.f32.vlgmr.msra.gmra.mrb[10].mxu1 %vm822_vm3, %v1150_v4 }
 0x5fc   : > { %1915 = vmatpush3.msra.mxu1 %v1239_v5  ;;  %1916 = vmatprep.mubr.msk.f32.mxu1 %vm2388_vm0, %v2389_v1 }
 0x5fd   : > { %1919 = vmatprep.subr.mxu1 %v2389_v1 }
 0x6ca   : > { %v1145_v6 = vpop.f32.mrb[8].mxu1 }
 0x6cb   : > { %v1908_v7 = vpop.f32.mrb[9].mxu1 }
 0x6ce   : > { %v1223_v8 = vpop.f32.mrb[10].mxu1 }
 0x6cf   : > { %v1913_v9 = vpop.f32.mrb[11].mxu1  ;;  %v1227_v10 = vsel %vm822_vm3, %v1223_v8, -inf }
 0x6d0   : > { %1228 = vmax.xlane.f32.xlu0 %v1227_v10 }
 0x75d   : > { %v1229_v11 = vpop.xlane.xlu0 %1228 }
 0x75e   : > { %v1230_v12 = vsub.f32 %v1223_v8, %v1229_v11 }
 0x760   : > { %v1231_v13 = vmul.f32 1.442695, %v1230_v12 }
 0x762   : > { %2088 = vpow2.f32 %v1231_v13 }
 0x76c   : > { %v2089_v14 = vpop.eup %2088 }
 0x76d   : > { %v1233_v15 = vsel %vm822_vm3, %v2089_v14, 0.0 }
 0x76e   : > { %1234 = vadd.xlane.f32.xlu1 %v1233_v15 }
 0x77f   : > { %1314 = vrot.lane.b32.xlu1 %v2809_v25, %s2392_s17 }
 0x7fb   : > { %v1235_v17 = vpop.xlane.xlu1 %1234 }
 0x7fc   : > { %2090 = vrcp.f32 %v1235_v17 }
 0x7ff   : > { %v1315_v20 = vpop.permute.xlu1 %1314 }
 0x806   : > { %v2091_v18 = vpop.eup %2090 }
 0x807   : > { %v1237_v19 = vmul.f32 %v2091_v18, %v2089_v14 }
 0x809   : > { %1917 = vmatmul.mubr.msk.f32.vlgmr.msra.gmra.mrb[12].mxu1 %vm822_vm3, %v1237_v19 }
 0x80a   : > { %1920 = vmatpush3.xpose.msk.msra.mxu1 %vm822_vm3, %v1317_v16  ;;  %1921 = vmatprep.mubr.msk.f32.mxu1 %vm2388_vm0, %v2389_v1 }
 0x80b   : > { %1924 = vmatprep.subr.mxu1 %v2389_v1 }
 0x80d   : > { %1922 = vmatmul.mubr.msk.f32.vlgmr.msra.gmra.mrb[14].mxu1 %vm822_vm3, %v1315_v20 }
 0x80e   : > { %1926 = vmatprep.mubr.msk.f32.mxu1 %vm2388_vm0, %v2389_v1 }
 0x8dc   : > { %v1310_v21 = vpop.f32.mrb[12].mxu1 }
 0x8dd   : > { %v1918_v22 = vpop.f32.mrb[13].mxu1 }
 0x8e0   : > { %v1388_v23 = vpop.f32.mrb[14].mxu1 }
 0x8e1   : > { %v1923_v24 = vpop.f32.mrb[15].mxu1  ;;  %v1392_v25 = vsel %vm822_vm3, %v1388_v23, -inf }
 0x8e2   : > { %1393 = vmax.xlane.f32.xlu0 %v1392_v25 }
 0x8f8   : > { %1403 = vrot.lane.b32.xlu0 %v2831_v43, %s2392_s17 }
 0x8fc   : > { %1480 = vrot.lane.b32.xlu0 %v1145_v6, %s2393_s14  ;;  %s3034_s14 = sld [smem:[#allocation32_spill]] }
 0x900   : > { %1484 = vrot.lane.b32.xlu0 %v1310_v21, %s2394_s20 }
 0x902   : > { %s2909_s20 = scalar_lea.hbm %s3034_s14, %s1817_s13 }
 0x96f   : > { %v1394_v26 = vpop.xlane.xlu0 %1393 }
 0x970   : > { %v1395_v27 = vsub.f32 %v1388_v23, %v1394_v26 }
 0x972   : > { %v1396_v28 = vmul.f32 1.442695, %v1395_v27 }
 0x973   : > { %v1404_v29 = vpop.permute.xlu0 %1403 }
 0x974   : > { %2092 = vpow2.f32 %v1396_v28  ;;  %1925 = vmatpush3.msra.mxu1 %v1404_v29 }
 0x977   : > { %v1481_v42 = vpop.permute.xlu0 %1480 }
 0x978   : > { %v1491_v43 = vsel %vm822_vm3, %v2843_v50, %v1481_v42 }
 0x97b   : > { %v1485_v0 = vpop.permute.xlu0 %1484 }
 0x97c   : > { %v1493_v44 = vsel %vm1492_vm4, %v1491_v43, %v1485_v0 }
 0x97e   : > { %v2093_v1 = vpop.eup %2092 }
 0x97f   : > { %v1398_v30 = vsel %vm822_vm3, %v2093_v1, 0.0 }
 0x980   : > { %1399 = vadd.xlane.f32.xlu1 %v1398_v30 }
 0xa0d   : > { %v1400_v31 = vpop.xlane.xlu1 %1399 }
 0xa0e   : > { %2094 = vrcp.f32 %v1400_v31 }
 0xa18   : > { %v2095_v32 = vpop.eup %2094 }
 0xa19   : > { %v1402_v33 = vmul.f32 %v2095_v32, %v2093_v1 }
 0xa1b   : > { %1927 = vmatmul.mubr.msk.f32.vlgmr.msra.gmra.mrb[16].mxu1 %vm822_vm3, %v1402_v33 }
 0xaee   : > { %v1475_v40 = vpop.f32.mrb[16].mxu1 }
 0xaef   : > { %1488 = vrot.lane.b32.xlu0 %v1475_v40, %s2395_s12  ;;  %v1928_v41 = vpop.f32.mrb[17].mxu1 }
 0xb61   : > { %v1489_v45 = vpop.permute.xlu0 %1488 }
 0xb62   : > { %v1495_v46 = vsel %vm1494_vm5, %v1493_v44, %v1489_v45 }
 0xb63   : > { %1938 = vmatmul.mubr.msk.f32.vlgmr.msra.gmra.mrb[4].mxu0 %vm543_vm1, %v1495_v46 }
 0xc36   : > { %v1588_v47 = vpop.f32.mrb[4].mxu0 }
 0xc37   : > { %v1589_v48 = vadd.f32 %v1810_v2, %v1588_v47  ;;  %v1939_v49 = vpop.f32.mrb[5].mxu0 }
 0xc39   : > { %1592 = vst.msk [vmem:[%s528_s7] sm:$0xff] %vm543_vm1, %v1589_v48 }
 0xc3a   : > { %2311 = shalt.err (!%p2308_p4)
}
 0xc3b   : > { %s2312_s25 = scalar_lea.hbm %s2909_s20, 128  ;;  %s2316_s4 = scalar_lea.hbm %s3034_s14, 256 }
 0xc3c   : > { %p2313_p10 = scmp.ne.s32.totalorder %s2909_s20, %s2312_s25  ;;  %p2317_p12 = scmp.lt.u32.totalorder %s2909_s20, %s3034_s14 }
 0xc3d   : > { %p2318_p0 = scmp.lt.u32.totalorder %s2316_s4, %s2312_s25  ;;  %p2320_p9 = scmp.lt.u32.totalorder %s2312_s25, %s2909_s20 }
 0xc3e   : > { %p2314_p3 = pnand %p2313_p10, %p3035_p13 }
 0xc3f   : > { %p2319_p7 = por %p2318_p0, %p2317_p12 }
 0xc40   : > { %p2315_p8 = pneg %p2314_p3 }
 0xc41   : > { %p2321_p11 = por %p2320_p9, %p2319_p7 }
 0xc43   : > { %p2322_p1 = pnand %p2321_p11, %p2315_p8 }
 0xc45   : > { %2325 = shalt.err (!%p2322_p1)
}
 0xc46   : > { %1994 = dma.vmem_to_hbm [thread:$0]  (%p3035_p13), %s2911_s29, 128, %s2909_s20, %s1594_s22  }
 0xc47 PF: > { %s3036_s12 = sld [smem:[#allocation20_spill]]  ;;  %s3037_s16 = sld [smem:[#allocation25_spill]] }
 0xc48   : > { %s3038_s28 = sld [smem:[#allocation21_spill]] }
 0xc4d   : > { %s1619_s27 = sand.u32 1, %s3036_s12   ;;  %p3039_p6 = scmp.ne.s32.totalorder %s3037_s16, 0 }
 0xc4e   : > { %p3040_p5 = scmp.ge.s32.totalorder %s3038_s28, 2  ;;  %s1620_s13 = scalar_lea.sflag [#allocation4], %s1619_s27 }
 0xc50   : > { %p2020_p2 = pnand %p3040_p5, %p3039_p6 }
 0xc52   : > { %2359 = dma.done.wait (!%p2020_p2), %s1620_s13, 128  }
 0xc53   : > { %2361 = vsyncadd (!%p2020_p2), %s1620_s13, 4294967168  ;;  %s3041_s20 = sld [smem:[#allocation22_spill]]  ;;  %s3042_s7 = sld [smem:[#allocation23_spill]] }
 0xc54   : > { %s3043_s17 = smov %s2368_s18  ;;  %s3044_s18 = smov %s2372_s19 }
 0xc59   : > { %p29_p4 = scmp.ge.s32.totalorder %s3041_s20, 4   ;;  %s3045_s19 = smov %s3042_s7 }
 0xc5b   :  { %31 = sbr.rel (!%p29_p4) target bundleno = 17 (0x11), region = 149 }
 0xc62   :  { %1625 = vsyncpa [#allocation3], 1 }
 0xc63   :  { %1627 = vsyncpa [#allocation3 + $0x1], 1 }
 0xc64   :  { %1628 = vsyncpa [#allocation6], 1 }
 0xc65   :  { %1630 = vsyncpa [#allocation6 + $0x1], 1 }
 0xc66   :  { %1631 = vsyncpa [#allocation9], 1 }
 0xc67   :  { %1632 = vsyncpa [#allocation12], 1 }
 0xc68   :  { %1633 = vsyncpa [#allocation4], 1 }
 0xc69   :  { %1635 = vsyncpa [#allocation4 + $0x1], 1 }

</bundles_post_ra>
